<compile_context>
chip_gen: v7x
topology: tpu7x:2x2x1
jax: 0.10.0
libtpu: 0.0.40
codegen_flags: <defaults>
</compile_context>

<pallas_src>
import functools

import jax
import jax.numpy as jnp
from jax.experimental import pallas as pl
from jax.experimental.pallas import tpu as pltpu

EPS = 1e-5        # PyTorch BatchNorm2d default eps
LANE = 128        # TPU lane width
SUB = 8           # sublane granularity -> channel padding target
MAX_TILE = 2048   # target output pixels (lanes) per grid step


def _pick_tile(hw: int, target: int = MAX_TILE) -> int:
    """Largest multiple of 128 dividing hw and <= target; fall back to hw (full dim)."""
    cand = [t for t in range(LANE, min(hw, target) + 1, LANE) if hw % t == 0]
    return max(cand) if cand else hw


# ----------------------------- Pallas kernels ------------------------------ #

def _conv_stats_kernel(p_ref, w_ref, sum_ref, sq_ref):
    # p_ref:   (1, K, THW)  bf16 patch tile (pixels lane-dense)
    # w_ref:   (Cg, K)      bf16 weights (resident)
    # sum_ref, sq_ref: (1, Cg, 1) f32 per-batch accumulators (resident across tile axis)
    @pl.when(pl.program_id(1) == 0)
    def _init():
        sum_ref[...] = jnp.zeros_like(sum_ref)
        sq_ref[...] = jnp.zeros_like(sq_ref)

    y = jnp.dot(w_ref[...], p_ref[0], preferred_element_type=jnp.float32)  # (Cg, THW)
    sum_ref[0] += jnp.sum(y, axis=1, keepdims=True)
    sq_ref[0] += jnp.sum(y * y, axis=1, keepdims=True)


def _conv_norm_kernel(p_ref, w_ref, scale_ref, shift_ref, o_ref):
    # Recompute the conv tile on the MXU and apply the folded BN affine.
    # scale_ref / shift_ref: (Cg, 1) f32 ; o_ref: (1, Cg, THW) f32 (NCHW-flat, lane-dense).
    y = jnp.dot(w_ref[...], p_ref[0], preferred_element_type=jnp.float32)  # (Cg, THW)
    o_ref[0] = y * scale_ref[...] + shift_ref[...]


# ------------------------------- wrapper ----------------------------------- #

@functools.partial(jax.jit, static_argnames=("factor",))
def downsample(x, weight, bias, gamma, beta, factor=2):
    """x: (N, Cin, H, W) f32 NCHW. weight: (Cout, Cin, 3, 3). Returns NCHW f32."""
    del bias  # conv bias cancels exactly under training-mode BatchNorm
    N, Cin, H, W = x.shape
    Cout = weight.shape[0]
    s = factor
    KH = KW = 3
    Ho = (H + 2 - KH) // s + 1
    Wo = (W + 2 - KW) // s + 1
    HW = Ho * Wo
    K = KH * KW * Cin
    Cg = ((Cout + SUB - 1) // SUB) * SUB   # channels padded to a sublane multiple

    # --- glue: im2col patches (N, K, HW) bf16, pixels on the lane axis ---------
    xp = jnp.pad(x.astype(jnp.bfloat16), ((0, 0), (0, 0), (1, 1), (1, 1)))
    taps = []
    for kh in range(KH):
        for kw in range(KW):
            taps.append(xp[:, :, kh:kh + s * (Ho - 1) + 1:s,
                                 kw:kw + s * (Wo - 1) + 1:s])   # (N, Cin, Ho, Wo)
    # K index = cin*9 + kh*3 + kw, matching weight.reshape(Cout, Cin*9)
    patches = jnp.stack(taps, axis=2).reshape(N, K, HW)

    # weight (Cout, Cin, KH, KW) -> (Cout, K) -> zero-pad rows to (Cg, K), bf16
    wmat = weight.reshape(Cout, K).astype(jnp.bfloat16)
    wmat = jnp.pad(wmat, ((0, Cg - Cout), (0, 0)))

    THW = _pick_tile(HW)
    n_t = HW // THW
    grid = (N, n_t)

    flops = 2 * N * HW * K * Cg
    bytes_p = N * HW * K * 2
    bytes_w = Cg * K * 2

    # ---- pass 1: conv tiles -> per-batch per-channel sum / sum-of-squares ----
    stats_spec = pl.BlockSpec((1, Cg, 1), lambda n, t: (n, 0, 0))
    ysum, ysq = pl.pallas_call(
        _conv_stats_kernel,
        out_shape=(jax.ShapeDtypeStruct((N, Cg, 1), jnp.float32),
                   jax.ShapeDtypeStruct((N, Cg, 1), jnp.float32)),
        grid=grid,
        in_specs=[pl.BlockSpec((1, K, THW), lambda n, t: (n, 0, t)),
                  pl.BlockSpec((Cg, K), lambda n, t: (0, 0))],
        out_specs=(stats_spec, stats_spec),
        compiler_params=pltpu.CompilerParams(
            dimension_semantics=("parallel", "arbitrary"),
            vmem_limit_bytes=32 * 1024 * 1024),
        cost_estimate=pl.CostEstimate(
            flops=flops, transcendentals=0,
            bytes_accessed=bytes_p + bytes_w + 2 * N * Cg * 4),
    )(patches, wmat)

    # ---- finalize BN stats (tiny (Cg,)-sized math; biased variance as in BN) ----
    count = float(N * HW)
    mean = (jnp.sum(ysum, axis=0) / count).reshape(Cg)
    ex2 = (jnp.sum(ysq, axis=0) / count).reshape(Cg)
    var = jnp.maximum(ex2 - mean * mean, 0.0)
    gamma_p = jnp.pad(gamma.astype(jnp.float32), (0, Cg - Cout))
    beta_p = jnp.pad(beta.astype(jnp.float32), (0, Cg - Cout))
    scale_v = gamma_p * jax.lax.rsqrt(var + EPS)
    shift_v = beta_p - mean * scale_v
    scale = scale_v.reshape(Cg, 1)
    shift = shift_v.reshape(Cg, 1)

    # ---- pass 2: recompute conv tiles, apply folded BN affine (fully parallel) ----
    out_flat = pl.pallas_call(
        _conv_norm_kernel,
        out_shape=jax.ShapeDtypeStruct((N, Cg, HW), jnp.float32),
        grid=grid,
        in_specs=[pl.BlockSpec((1, K, THW), lambda n, t: (n, 0, t)),
                  pl.BlockSpec((Cg, K), lambda n, t: (0, 0)),
                  pl.BlockSpec((Cg, 1), lambda n, t: (0, 0)),
                  pl.BlockSpec((Cg, 1), lambda n, t: (0, 0))],
        out_specs=pl.BlockSpec((1, Cg, THW), lambda n, t: (n, 0, t)),
        compiler_params=pltpu.CompilerParams(
            dimension_semantics=("parallel", "parallel"),
            vmem_limit_bytes=32 * 1024 * 1024),
        cost_estimate=pl.CostEstimate(
            flops=flops, transcendentals=0,
            bytes_accessed=bytes_p + bytes_w + N * HW * Cg * 4),
    )(patches, wmat, scale, shift)

    if Cg != Cout:
        out_flat = out_flat[:, :Cout, :]
    return out_flat.reshape(N, Cout, Ho, Wo)   # already NCHW, no transpose


# ------------------------------ reference ---------------------------------- #

def _reference(x, weight, bias, gamma, beta, factor=2, cast_bf16=False):
    """Conv2d(stride=factor, pad=1) + training-mode BatchNorm2d (pure JAX)."""
    s = factor
    Cout = weight.shape[0]
    xc = x.astype(jnp.bfloat16) if cast_bf16 else x
    wc = weight.astype(jnp.bfloat16) if cast_bf16 else weight
    y = jax.lax.conv_general_dilated(
        xc, wc, window_strides=(s, s), padding=((1, 1), (1, 1)),
        dimension_numbers=("NCHW", "OIHW", "NCHW"),
        preferred_element_type=jnp.float32)
    y = y + bias.reshape(1, Cout, 1, 1)
    mean = y.mean(axis=(0, 2, 3), keepdims=True)
    var = ((y - mean) ** 2).mean(axis=(0, 2, 3), keepdims=True)
    yhat = (y - mean) * jax.lax.rsqrt(var + EPS)
    return gamma.reshape(1, Cout, 1, 1) * yhat + beta.reshape(1, Cout, 1, 1)


if __name__ == "__main__":
    # DownSample(in_channels=4, nfilters=4, factor=2) -> Cout = nfilters*factor = 8
    N, Cin, H, W = 2, 4, 16, 16
    nfilters, factor = 4, 2
    Cout = nfilters * factor

    key = jax.random.PRNGKey(0)
    kx, kw, kb = jax.random.split(key, 3)
    x = jax.random.normal(kx, (N, Cin, H, W), dtype=jnp.float32)
    weight = 0.1 * jax.random.normal(kw, (Cout, Cin, 3, 3), dtype=jnp.float32)
    bias = 0.1 * jax.random.normal(kb, (Cout,), dtype=jnp.float32)
    gamma = jnp.ones((Cout,), dtype=jnp.float32)   # BN default weight init
    beta = jnp.zeros((Cout,), dtype=jnp.float32)   # BN default bias init

    out = downsample(x, weight, bias, gamma, beta, factor=factor)
    out = jax.block_until_ready(out)
    assert out.shape == (N, Cout, H // factor, W // factor), out.shape

    # Tight check against a reference using the same bf16 input quantization.
    ref_bf = _reference(x, weight, bias, gamma, beta, factor=factor, cast_bf16=True)
    err_bf = float(jnp.max(jnp.abs(out - ref_bf)))
    assert err_bf < 2e-3, err_bf

    # Sanity check against the exact f32 module semantics (bf16 MXU inputs ->
    # post-BN outputs have ~unit scale, so a few e-2 absolute is expected noise).
    ref_f32 = _reference(x, weight, bias, gamma, beta, factor=factor, cast_bf16=False)
    err_f32 = float(jnp.max(jnp.abs(out - ref_f32)))
    assert err_f32 < 1e-1, err_f32

    print("KERNEL_OK")
</pallas_src>

<mosaic_0001>
module attributes {stable_mosaic.version = 11 : i64} {
  func.func @_conv_stats_kernel(%arg0: i32, %arg1: i32, %arg2: memref<1x36x64xbf16, #tpu.memory_space<vmem>>, %arg3: memref<8x36xbf16, #tpu.memory_space<vmem>>, %arg4: memref<1x8x1xf32, #tpu.memory_space<vmem>>, %arg5: memref<1x8x1xf32, #tpu.memory_space<vmem>>) attributes {dimension_semantics = [#tpu.dimension_semantics<parallel>, #tpu.dimension_semantics<arbitrary>], iteration_bounds = array<i64: 2, 1>, scalar_prefetch = 0 : i64, scratch_operands = 0 : i64, tpu.core_type = #tpu.core_type<tc>, window_params = [{transform_indices = @transform_0, window_bounds = array<i64: 1, 36, 64>}, {pipeline_mode = #tpu.pipeline_mode<synchronous>, transform_indices = @transform_1, window_bounds = array<i64: 8, 36>}, {transform_indices = @transform_2, window_bounds = array<i64: 1, 8, 1>}, {transform_indices = @transform_3, window_bounds = array<i64: 1, 8, 1>}]} {
    %c0_i32 = arith.constant 0 : i32
    %0 = arith.cmpi eq, %arg1, %c0_i32 : i32
    %1 = arith.extui %0 : i1 to i32
    %c0_i32_0 = arith.constant 0 : i32
    %2 = arith.cmpi ne, %1, %c0_i32_0 : i32
    scf.if %2 {
      %cst_19 = arith.constant 0.000000e+00 : f32
      %24 = vector.broadcast %cst_19 : f32 to vector<1x8x1xf32>
      %c0_20 = arith.constant 0 : index
      %c0_21 = arith.constant 0 : index
      %c0_22 = arith.constant 0 : index
      %25 = vector.load %arg4[%c0_20, %c0_21, %c0_22] : memref<1x8x1xf32, #tpu.memory_space<vmem>>, vector<1x8x1xf32>
      tpu.vector_store %arg4[%c0_20, %c0_21, %c0_22], %24 {strides = array<i32>} : memref<1x8x1xf32, #tpu.memory_space<vmem>>, vector<1x8x1xf32>,
      %cst_23 = arith.constant 0.000000e+00 : f32
      %26 = vector.broadcast %cst_23 : f32 to vector<1x8x1xf32>
      %c0_24 = arith.constant 0 : index
      %c0_25 = arith.constant 0 : index
      %c0_26 = arith.constant 0 : index
      %27 = vector.load %arg5[%c0_24, %c0_25, %c0_26] : memref<1x8x1xf32, #tpu.memory_space<vmem>>, vector<1x8x1xf32>
      tpu.vector_store %arg5[%c0_24, %c0_25, %c0_26], %26 {strides = array<i32>} : memref<1x8x1xf32, #tpu.memory_space<vmem>>, vector<1x8x1xf32>,
    } else {
    }
    %c0 = arith.constant 0 : index
    %c0_1 = arith.constant 0 : index
    %3 = vector.load %arg3[%c0, %c0_1] : memref<8x36xbf16, #tpu.memory_space<vmem>>, vector<8x36xbf16>
    %c0_2 = arith.constant 0 : index
    %c0_3 = arith.constant 0 : index
    %c0_4 = arith.constant 0 : index
    %4 = vector.load %arg2[%c0_2, %c0_3, %c0_4] : memref<1x36x64xbf16, #tpu.memory_space<vmem>>, vector<1x36x64xbf16>
    %5 = vector.shape_cast %4 : vector<1x36x64xbf16> to vector<36x64xbf16>
    %cst = arith.constant dense<0.000000e+00> : vector<8x64xf32>
    %6 = tpu.matmul %3, %5, %cst {dimension_numbers = #tpu.dot_dimension_numbers<[1], [0], [0], [1], [0, 0, 1, 1], [], []>} : vector<8x36xbf16>, vector<36x64xbf16>, vector<8x64xf32> -> vector<8x64xf32>
    %c0_5 = arith.constant 0 : index
    %c0_6 = arith.constant 0 : index
    %c0_7 = arith.constant 0 : index
    %7 = vector.load %arg4[%c0_5, %c0_6, %c0_7] : memref<1x8x1xf32, #tpu.memory_space<vmem>>, vector<1x8x1xf32>
    %8 = vector.shape_cast %7 : vector<1x8x1xf32> to vector<8x1xf32>
    %cst_8 = arith.constant dense<0.000000e+00> : vector<8xf32>
    %9 = vector.multi_reduction <add>, %6, %cst_8 [1] : vector<8x64xf32> to vector<8xf32>
    %10 = vector.shape_cast %9 : vector<8xf32> to vector<8x1xf32>
    %11 = arith.addf %8, %10 : vector<8x1xf32>
    %c0_9 = arith.constant 0 : index
    %c0_10 = arith.constant 0 : index
    %c0_11 = arith.constant 0 : index
    %12 = vector.load %arg4[%c0_9, %c0_10, %c0_11] : memref<1x8x1xf32, #tpu.memory_space<vmem>>, vector<1x8x1xf32>
    %13 = vector.shape_cast %12 : vector<1x8x1xf32> to vector<8x1xf32>
    %14 = vector.shape_cast %11 : vector<8x1xf32> to vector<1x8x1xf32>
    tpu.vector_store %arg4[%c0_9, %c0_10, %c0_11], %14 {strides = array<i32>} : memref<1x8x1xf32, #tpu.memory_space<vmem>>, vector<1x8x1xf32>,
    %c0_12 = arith.constant 0 : index
    %c0_13 = arith.constant 0 : index
    %c0_14 = arith.constant 0 : index
    %15 = vector.load %arg5[%c0_12, %c0_13, %c0_14] : memref<1x8x1xf32, #tpu.memory_space<vmem>>, vector<1x8x1xf32>
    %16 = vector.shape_cast %15 : vector<1x8x1xf32> to vector<8x1xf32>
    %17 = arith.mulf %6, %6 : vector<8x64xf32>
    %cst_15 = arith.constant dense<0.000000e+00> : vector<8xf32>
    %18 = vector.multi_reduction <add>, %17, %cst_15 [1] : vector<8x64xf32> to vector<8xf32>
    %19 = vector.shape_cast %18 : vector<8xf32> to vector<8x1xf32>
    %20 = arith.addf %16, %19 : vector<8x1xf32>
    %c0_16 = arith.constant 0 : index
    %c0_17 = arith.constant 0 : index
    %c0_18 = arith.constant 0 : index
    %21 = vector.load %arg5[%c0_16, %c0_17, %c0_18] : memref<1x8x1xf32, #tpu.memory_space<vmem>>, vector<1x8x1xf32>
    %22 = vector.shape_cast %21 : vector<1x8x1xf32> to vector<8x1xf32>
    %23 = vector.shape_cast %20 : vector<8x1xf32> to vector<1x8x1xf32>
    tpu.vector_store %arg5[%c0_16, %c0_17, %c0_18], %23 {strides = array<i32>} : memref<1x8x1xf32, #tpu.memory_space<vmem>>, vector<1x8x1xf32>,
    return
  }
  func.func @transform_0(%arg0: i32, %arg1: i32) -> (i32, i32, i32) {
    %c0_i32 = arith.constant 0 : i32
    %c0_i32_0 = arith.constant 0 : i32
    return %arg0, %c0_i32, %arg1 : i32, i32, i32
  }
  func.func @transform_1(%arg0: i32, %arg1: i32) -> (i32, i32) {
    %c0_i32 = arith.constant 0 : i32
    %c0_i32_0 = arith.constant 0 : i32
    %c0_i32_1 = arith.constant 0 : i32
    return %c0_i32, %c0_i32_0 : i32, i32
  }
  func.func @transform_2(%arg0: i32, %arg1: i32) -> (i32, i32, i32) {
    %c0_i32 = arith.constant 0 : i32
    %c0_i32_0 = arith.constant 0 : i32
    %c0_i32_1 = arith.constant 0 : i32
    return %arg0, %c0_i32, %c0_i32_0 : i32, i32, i32
  }
  func.func @transform_3(%arg0: i32, %arg1: i32) -> (i32, i32, i32) {
    %c0_i32 = arith.constant 0 : i32
    %c0_i32_0 = arith.constant 0 : i32
    %c0_i32_1 = arith.constant 0 : i32
    return %arg0, %c0_i32, %c0_i32_0 : i32, i32, i32
  }
}

module attributes {stable_mosaic.version = 11 : i64} {
  func.func @_conv_norm_kernel(%arg0: i32, %arg1: i32, %arg2: memref<1x36x64xbf16, #tpu.memory_space<vmem>>, %arg3: memref<8x36xbf16, #tpu.memory_space<vmem>>, %arg4: memref<8x1xf32, #tpu.memory_space<vmem>>, %arg5: memref<8x1xf32, #tpu.memory_space<vmem>>, %arg6: memref<1x8x64xf32, #tpu.memory_space<vmem>>) attributes {dimension_semantics = [#tpu.dimension_semantics<parallel>, #tpu.dimension_semantics<parallel>], iteration_bounds = array<i64: 2, 1>, scalar_prefetch = 0 : i64, scratch_operands = 0 : i64, tpu.core_type = #tpu.core_type<tc>, window_params = [{transform_indices = @transform_0, window_bounds = array<i64: 1, 36, 64>}, {pipeline_mode = #tpu.pipeline_mode<synchronous>, transform_indices = @transform_1, window_bounds = array<i64: 8, 36>}, {pipeline_mode = #tpu.pipeline_mode<synchronous>, transform_indices = @transform_2, window_bounds = array<i64: 8, 1>}, {pipeline_mode = #tpu.pipeline_mode<synchronous>, transform_indices = @transform_3, window_bounds = array<i64: 8, 1>}, {transform_indices = @transform_4, window_bounds = array<i64: 1, 8, 64>}]} {
    %c0 = arith.constant 0 : index
    %c0_0 = arith.constant 0 : index
    %0 = vector.load %arg3[%c0, %c0_0] : memref<8x36xbf16, #tpu.memory_space<vmem>>, vector<8x36xbf16>
    %c0_1 = arith.constant 0 : index
    %c0_2 = arith.constant 0 : index
    %c0_3 = arith.constant 0 : index
    %1 = vector.load %arg2[%c0_1, %c0_2, %c0_3] : memref<1x36x64xbf16, #tpu.memory_space<vmem>>, vector<1x36x64xbf16>
    %2 = vector.shape_cast %1 : vector<1x36x64xbf16> to vector<36x64xbf16>
    %cst = arith.constant dense<0.000000e+00> : vector<8x64xf32>
    %3 = tpu.matmul %0, %2, %cst {dimension_numbers = #tpu.dot_dimension_numbers<[1], [0], [0], [1], [0, 0, 1, 1], [], []>} : vector<8x36xbf16>, vector<36x64xbf16>, vector<8x64xf32> -> vector<8x64xf32>
    %c0_4 = arith.constant 0 : index
    %c0_5 = arith.constant 0 : index
    %4 = vector.load %arg4[%c0_4, %c0_5] : memref<8x1xf32, #tpu.memory_space<vmem>>, vector<8x1xf32>
    %5 = vector.broadcast %4 : vector<8x1xf32> to vector<8x64xf32>
    %6 = arith.mulf %3, %5 : vector<8x64xf32>
    %c0_6 = arith.constant 0 : index
    %c0_7 = arith.constant 0 : index
    %7 = vector.load %arg5[%c0_6, %c0_7] : memref<8x1xf32, #tpu.memory_space<vmem>>, vector<8x1xf32>
    %8 = vector.broadcast %7 : vector<8x1xf32> to vector<8x64xf32>
    %9 = arith.addf %6, %8 : vector<8x64xf32>
    %c0_8 = arith.constant 0 : index
    %c0_9 = arith.constant 0 : index
    %c0_10 = arith.constant 0 : index
    %10 = vector.load %arg6[%c0_8, %c0_9, %c0_10] : memref<1x8x64xf32, #tpu.memory_space<vmem>>, vector<1x8x64xf32>
    %11 = vector.shape_cast %10 : vector<1x8x64xf32> to vector<8x64xf32>
    %12 = vector.shape_cast %9 : vector<8x64xf32> to vector<1x8x64xf32>
    tpu.vector_store %arg6[%c0_8, %c0_9, %c0_10], %12 {strides = array<i32>} : memref<1x8x64xf32, #tpu.memory_space<vmem>>, vector<1x8x64xf32>,
    return
  }
  func.func @transform_0(%arg0: i32, %arg1: i32) -> (i32, i32, i32) {
    %c0_i32 = arith.constant 0 : i32
    %c0_i32_0 = arith.constant 0 : i32
    return %arg0, %c0_i32, %arg1 : i32, i32, i32
  }
  func.func @transform_1(%arg0: i32, %arg1: i32) -> (i32, i32) {
    %c0_i32 = arith.constant 0 : i32
    %c0_i32_0 = arith.constant 0 : i32
    %c0_i32_1 = arith.constant 0 : i32
    return %c0_i32, %c0_i32_0 : i32, i32
  }
  func.func @transform_2(%arg0: i32, %arg1: i32) -> (i32, i32) {
    %c0_i32 = arith.constant 0 : i32
    %c0_i32_0 = arith.constant 0 : i32
    %c0_i32_1 = arith.constant 0 : i32
    return %c0_i32, %c0_i32_0 : i32, i32
  }
  func.func @transform_3(%arg0: i32, %arg1: i32) -> (i32, i32) {
    %c0_i32 = arith.constant 0 : i32
    %c0_i32_0 = arith.constant 0 : i32
    %c0_i32_1 = arith.constant 0 : i32
    return %c0_i32, %c0_i32_0 : i32, i32
  }
  func.func @transform_4(%arg0: i32, %arg1: i32) -> (i32, i32, i32) {
    %c0_i32 = arith.constant 0 : i32
    %c0_i32_0 = arith.constant 0 : i32
    return %arg0, %c0_i32, %arg1 : i32, i32, i32
  }
}

</mosaic_0001>

<bundles_post_ra>
// kernel: downsample.3
= control target key start
LH: loop header
LB: loop body
LE: loop exit
PB: predicated region body
PF: predicated region fallthrough
CT: control target
= control target key end

     0   :  { %s501_s15 = smov 0   ;;  %s503_s16 = smov 0   ;;  %s543_s0 = inlined_call_operand.vmem [shape: bf16[2,36,64], index: 0, kind: input, shape index: {}]   ;;  %s544_s1 = inlined_call_operand.vmem [shape: bf16[8,36], index: 1, kind: input, shape index: {}]   ;;  %s545_s2 = inlined_call_operand.vmem [shape: f32[8,1], index: 2, kind: input, shape index: {}]   ;;  %s546_s3 = inlined_call_operand.vmem [shape: f32[8,1], index: 3, kind: input, shape index: {}]   ;;  %s547_s4 = inlined_call_operand.vmem [shape: f32[2,8,64], index: 4, kind: output, shape index: {}]  }
   0x1   :  { %s505_s17 = smov 0  }
   0x2 LB: > { %s26_s18 = sadd.s32 1, %s467_s16  ;;  %p394_p0 = scmp.ge.s32.totalorder %s471_s17, 1  ;;  %s471_s17 = sphi %s505_s17, %s14_s17   ;;  %s467_s16 = sphi %s503_s16, %s549_s16   ;;  %s463_s15 = sphi %s501_s15, %s548_s15  }
   0x3   : > { %p28_p1 = scmp.ge.s32.totalorder %s26_s18, 2  ;;  %p181_p2 = scmp.lt.s32.totalorder %s471_s17, 3 }
   0x5   : > { %s551_s18 = smov (%p28_p1, %s26_s18), 0  ;;  %p182_p3 = pnand %p394_p0, %p181_p2 }
   0x6   : > { %p212_p4 = scmp.lt.s32.totalorder (!%p182_p3), %s463_s15, 1  ;;  %v473_v0 = vmov (!%p182_p3), 0.0   ;;  %vm474_vm0 = vmmov (!%p182_p3), 0   ;;  %v297_v1 = vld [vmem:[%s545_s2] sm:$0xff] (!%p182_p3)  ;;  %v475_v2 = vmov (!%p182_p3), 0   ;;  %vm253_vm1 = vcmask (!%p182_p3), 1041408  }
   0x7   : > { %185 = sbr.rel (%p182_p3) target bundleno = 247 (0xf7), region = 36  ;;  %407 = vmatprep.subr.bf16.mxu0 (!%p182_p3), %v473_v0  ;;  %413 = vmatprep.mubr.msk.bf16.mxu0 (!%p182_p3), %vm474_vm0, %v473_v0  ;;  %v304_v3 = vld [vmem:[%s546_s3] sm:$0xff] (!%p182_p3)  ;;  %vm249_vm2 = vcmask (!%p182_p3), 293888   ;;  %vm311_vm3 = vcmask (!%p182_p3), 523264  }
   0x8   : > { %445 = vset.pattern.permute.xlu0 (!%p182_p3), %v475_v2  ;;  %v228_v8 = vld [vmem:[%s544_s1] sm:$0xf] (!%p182_p3) }
   0x9   : > { %300 = vperm.xlu0 (!%p182_p3), %445, %v297_v1  }
   0xd   : > { %307 = vperm.xlu0 (!%p182_p3), %445, %v304_v3  }
   0xe   : > { %s553_s15 = smov (!%p212_p4, %s463_s15), 1 }
   0xf   : > { %s417_s21 = smul.u32 20, %s553_s15  ;;  %s396_s29 = sshll.u32 %s553_s15, 3 }
  0x10   : > { %s226_s6 = scalar_lea.vmem %s547_s4, %s396_s29 }
  0x11   : > { %s219_s26 = scalar_lea.vmem %s543_s0, %s417_s21 }
  0x12   : > { %v446_v4 = vld [vmem:[%s219_s26] sm:$0xff]   ;;  %v447_v5 = vld [vmem:[%s219_s26 + $0x8] sm:$0xff]   ;;  %v448_v6 = vld [vmem:[%s219_s26 + $0x10] ss:$0 sps:$4 sm:$0x33]  }
  0x13   : > { %408 = vmatpush3.bf16.msra.mxu0 %v446_v4  ;;  %v255_v7 = vsel %vm253_vm1, %v448_v6, 0 }
  0x14   : > { %409 = vmatprep.subr.bf16.mxu0 %v473_v0 }
  0x17   : > { %410 = vmatpush3.bf16.msra.mxu0 %v447_v5 }
  0x18   : > { %411 = vmatprep.subr.bf16.mxu0 %v473_v0 }
  0x1b   : > { %412 = vmatpush3.bf16.msra.mxu0 %v255_v7 }
  0x1e   : > { %414 = vmatmul.mubr.msk.bf16.vlgmr.msra.gmra.mrb[0].mxu0 %vm249_vm2, %v228_v8 }
  0x88   : > { %v301_v9 = vpop.permute.xlu0 %300 }
  0x8c   : > { %v308_v13 = vpop.permute.xlu0 %307 }
  0xf1   : > { %v291_v10 = vpop.f32.mrb[0].mxu0 }
  0xf2   : > { %v303_v11 = vmul.f32 %v301_v9, %v291_v10  ;;  %v415_v12 = vpop.f32.mrb[1].mxu0 }
  0xf3   : > { %v294_v14 = vpop.f32.mrb[2].mxu0 }
  0xf4   : > { %v310_v15 = vadd.f32 %v308_v13, %v303_v11  ;;  %v416_v16 = vpop.f32.mrb[3].mxu0 }
  0xf6   : > { %312 = vst.msk [vmem:[%s226_s6] sm:$0xff] %vm311_vm3, %v310_v15 }
  0xf7 PF: > { %s14_s17 = sadd.s32 1, %s471_s17   ;;  %s548_s15 = smov %s467_s16 }
  0xf8   : > { %p11_p5 = scmp.ge.s32.totalorder %s14_s17, 4   ;;  %s549_s16 = smov %s551_s18 }
  0xfa   :  { %13 = sbr.rel (!%p11_p5) target bundleno = 2 (0x2), region = 66 }

// kernel: downsample.2
= control target key start
LH: loop header
LB: loop body
LE: loop exit
PB: predicated region body
PF: predicated region fallthrough
CT: control target
= control target key end

     0   :  { %s497_s12 = smov 0   ;;  %s499_s13 = smov 0   ;;  %s544_s0 = inlined_call_operand.vmem [shape: bf16[2,36,64], index: 0, kind: input, shape index: {}]   ;;  %s545_s1 = inlined_call_operand.vmem [shape: bf16[8,36], index: 1, kind: input, shape index: {}]   ;;  %s546_s2 = inlined_call_operand.vmem [shape: f32[2,8,1], index: 2, kind: output, shape index: {0}]   ;;  %s547_s3 = inlined_call_operand.vmem [shape: f32[2,8,1], index: 3, kind: output, shape index: {1}]  }
   0x1   :  { %s501_s14 = smov 0  }
   0x2 LB: > { %s26_s15 = sadd.s32 1, %s469_s13  ;;  %p397_p0 = scmp.ge.s32.totalorder %s473_s14, 1  ;;  %s473_s14 = sphi %s501_s14, %s14_s14   ;;  %s469_s13 = sphi %s499_s13, %s549_s13   ;;  %s465_s12 = sphi %s497_s12, %s548_s12  }
   0x3   : > { %p28_p1 = scmp.ge.s32.totalorder %s26_s15, 2  ;;  %p157_p2 = scmp.lt.s32.totalorder %s473_s14, 3 }
   0x5   : > { %s551_s15 = smov (%p28_p1, %s26_s15), 0  ;;  %p158_p3 = pnand %p397_p0, %p157_p2 }
   0x6   : > { %p187_p4 = scmp.lt.s32.totalorder (!%p158_p3), %s465_s12, 1  ;;  %v475_v0 = vmov (!%p158_p3), 0.0   ;;  %vm476_vm0 = vmmov (!%p158_p3), 0   ;;  %vm236_vm1 = vcmask (!%p158_p3), 1041408   ;;  %v211_v5 = vld [vmem:[%s545_s1] sm:$0xf] (!%p158_p3) }
   0x7   : > { %161 = sbr.rel (%p158_p3) target bundleno = 392 (0x188), region = 28  ;;  %411 = vmatprep.subr.bf16.mxu0 (!%p158_p3), %v475_v0  ;;  %417 = vmatprep.mubr.msk.bf16.mxu0 (!%p158_p3), %vm476_vm0, %v475_v0  ;;  %vm232_vm2 = vcmask (!%p158_p3), 293888   ;;  %vm208_vm3 = vcmask (!%p158_p3), 7168   ;;  %vm281_vm4 = vcmask (!%p158_p3), 523264  }
   0xe   : > { %s553_s12 = smov (!%p187_p4, %s465_s12), 1 }
   0xf   : > { %s421_s16 = smul.u32 20, %s553_s12  ;;  %s399_s22 = sshll.u32 %s553_s12, 3 }
  0x10   : > { %s198_s25 = scalar_lea.vmem %s546_s2, %s399_s22  ;;  %s202_s28 = scalar_lea.vmem %s547_s3, %s399_s22 }
  0x11   : > { %s194_s19 = scalar_lea.vmem %s544_s0, %s421_s16  ;;  %209 = vst.msk [vmem:[%s198_s25] sm:$0xff] %vm208_vm3, %v475_v0  ;;  %210 = vst.msk [vmem:[%s202_s28] sm:$0xff] %vm208_vm3, %v475_v0 }
  0x12   : > { %v448_v1 = vld [vmem:[%s194_s19] sm:$0xff]   ;;  %v449_v2 = vld [vmem:[%s194_s19 + $0x8] sm:$0xff]   ;;  %v450_v3 = vld [vmem:[%s194_s19 + $0x10] ss:$0 sps:$4 sm:$0x33]  }
  0x13   : > { %412 = vmatpush3.bf16.msra.mxu0 %v448_v1  ;;  %v238_v4 = vsel %vm236_vm1, %v450_v3, 0 }
  0x14   : > { %413 = vmatprep.subr.bf16.mxu0 %v475_v0 }
  0x17   : > { %414 = vmatpush3.bf16.msra.mxu0 %v449_v2 }
  0x18   : > { %415 = vmatprep.subr.bf16.mxu0 %v475_v0  ;;  %v280_v13 = vld [vmem:[%s198_s25] sm:$0xff] }
  0x19   : > { %v288_v16 = vld [vmem:[%s202_s28] sm:$0xff] }
  0x1b   : > { %416 = vmatpush3.bf16.msra.mxu0 %v238_v4 }
  0x1e   : > { %418 = vmatmul.mubr.msk.bf16.vlgmr.msra.gmra.mrb[0].mxu0 %vm232_vm2, %v211_v5 }
  0xf1   : > { %v274_v6 = vpop.f32.mrb[0].mxu0 }
  0xf2   : > { %v289_v7 = vmul.f32 %v274_v6, %v274_v6  ;;  %v419_v8 = vpop.f32.mrb[1].mxu0  ;;  %v282_v9 = vsel %vm281_vm4, %v274_v6, 0.0 }
  0xf3   : > { %283 = vadd.xlane.f32.xlu0 %v282_v9  ;;  %v277_v10 = vpop.f32.mrb[2].mxu0 }
  0xf4   : > { %v420_v11 = vpop.f32.mrb[3].mxu0  ;;  %v290_v12 = vsel %vm281_vm4, %v289_v7, 0.0 }
  0xf7   : > { %291 = vadd.xlane.f32.xlu0 %v290_v12 }
 0x180   : > { %v284_v14 = vpop.xlane.xlu0 %283 }
 0x181   : > { %v285_v15 = vadd.f32 %v284_v14, %v280_v13 }
 0x183   : > { %287 = vst.msk [vmem:[%s198_s25] sm:$0xff] %vm208_vm3, %v285_v15 }
 0x184   : > { %v292_v17 = vpop.xlane.xlu0 %291 }
 0x185   : > { %v293_v18 = vadd.f32 %v292_v17, %v288_v16 }
 0x187   : > { %294 = vst.msk [vmem:[%s202_s28] sm:$0xff] %vm208_vm3, %v293_v18 }
 0x188 PF: > { %s14_s14 = sadd.s32 1, %s473_s14   ;;  %s548_s12 = smov %s469_s13 }
 0x189   : > { %p11_p5 = scmp.ge.s32.totalorder %s14_s14, 4   ;;  %s549_s13 = smov %s551_s15 }
 0x18b   :  { %13 = sbr.rel (!%p11_p5) target bundleno = 2 (0x2), region = 74 }

</bundles_post_ra>
